<compile_context>
chip_gen: v7x
topology: tpu7x:2x2x1
jax: 0.10.0
libtpu: 0.0.40
codegen_flags: <defaults>
</compile_context>

<pallas_src>
import jax
import jax.numpy as jnp
import numpy as np
from jax.experimental import pallas as pl
from jax.experimental.pallas import tpu as pltpu

_LANE = 128


# ----------------------------------------------------------------------------- helpers

def _round_up(x, m):
    return (x + m - 1) // m * m


def _pad_dims(x, target_last_dims):
    """Zero-pad the trailing len(target_last_dims) axes of x up to the given sizes."""
    n = len(target_last_dims)
    pads = [(0, 0)] * (x.ndim - n)
    pads += [(0, t - d) for d, t in zip(x.shape[-n:], target_last_dims)]
    if all(p == (0, 0) for p in pads):
        return x
    return jnp.pad(x, pads)


def _gen_budgets():
    """(vmem_limit_bytes, per-streamed-buffer tile budget), generation aware."""
    try:
        vmem = int(pltpu.get_tpu_info().vmem_capacity_bytes)
    except Exception:
        vmem = 64 * 1024 * 1024          # assume the smallest per-core VMEM (v7x) if query fails
    if vmem >= 100 * 1024 * 1024:        # v5e / v6e: 128 MiB per core
        return 96 * 1024 * 1024, 24 * 1024 * 1024
    return 48 * 1024 * 1024, 12 * 1024 * 1024   # v7x: 64 MiB per core


def _pick_tile_rows(s128, row_bytes, budget):
    """Largest multiple-of-128 row count whose streamed tile fits the per-buffer budget.

    The streamed operand's row axis is zero-padded to a multiple of the tile, so the tile
    need not divide s128; we only require the padding waste to stay under ~1/16 of the data.
    The tile is also capped so the grid keeps >= 4 steps (pipelining + v7x dual-TC sharding)
    whenever the operand is big enough.
    """
    cap = max(_LANE, min(s128, (budget // max(row_bytes, 1)) // _LANE * _LANE))
    if s128 >= 4 * _LANE:
        cap = min(cap, max(_LANE, _round_up(s128 // 4, _LANE)))
    for tile in range(cap, _LANE - 1, -_LANE):
        if ((-s128) % tile) * 16 <= s128:
            return tile
    return _LANE


# ----------------------------------------------------------------------------- kernels

def _quad_shared_kernel(beta_rows_ref, beta_ref, scales_ref, invcov_ref, o_ref):
    """Partial of sum_g scales[g] * beta_g @ InvCov @ beta_g over one row-tile of InvCov.

    beta_rows_ref: (G, tr) columns of beta matching the streamed rows (stored dtype).
    beta_ref / scales_ref: resident f32 (G, S_pad) / (G, 1).
    invcov_ref: streamed (tr, S_pad) tile (stored dtype; fed to the MXU without upcast).
    """
    tmp = jnp.dot(beta_rows_ref[...], invcov_ref[...],
                  preferred_element_type=jnp.float32)                 # (G, S_pad) f32
    o_ref[...] = jnp.sum(tmp * beta_ref[...] * scales_ref[...],
                         axis=0, keepdims=True)                       # (1, S_pad)


def _quad_grouped_kernel(scales_ref, brt_ref, bfull_ref, invcov_ref, o_ref):
    """Partial of scales[g] * beta_g @ InvCov_g @ beta_g for grid cell (g, row-tile i).

    scales_ref: (G,) f32 in SMEM (scalar prefetch).
    brt_ref:   (1, 1, tr) row-tile of beta_g (stored dtype).
    bfull_ref: (1, 1, S_pad) full beta_g row, f32.
    invcov_ref: (1, tr, S_pad) streamed tile of InvCov_g (stored dtype).
    """
    g = pl.program_id(0)
    inner = jnp.dot(brt_ref[0], invcov_ref[0],
                    preferred_element_type=jnp.float32)                # (1, S_pad) f32
    o_ref[...] = inner * bfull_ref[0] * scales_ref[g]


def _kl_kernel(dp_ref, logp_ref, w_ref, o_ref):
    """Partial of sum_{i,j} (ce[i,i] - ce[i,j]) * w[i,j] over one row-tile of w.

    All softmax/log work is hoisted to the wrapper:
      dp_ref  : (G+1, tr)  -- row 0 = diag(ce) for the tile rows, rows 1..G = p tile columns.
      logp_ref: (G, S_pad) -- resident log p.
      w_ref   : (tr, S_pad) streamed weight tile (stored dtype).
    A single fused MXU dot gives both contractions; division by nnz happens outside.
    """
    m = jnp.dot(dp_ref[...], w_ref[...],
                preferred_element_type=jnp.float32)                    # (G+1, S_pad) f32
    term2 = jnp.sum(logp_ref[...] * m[1:, :], axis=0, keepdims=True)   # (1, S_pad)
    o_ref[...] = m[0:1, :] - term2


# ----------------------------------------------------------------------------- wrappers

def _quad_shared(beta_rows, beta_full, scales, invcov_p, s128, tr, num_tiles, vmem_limit):
    G = beta_rows.shape[0]
    cost = pl.CostEstimate(
        flops=int(2 * G * invcov_p.shape[0] * s128 + 3 * G * s128 * num_tiles),
        transcendentals=0,
        bytes_accessed=int(invcov_p.size * invcov_p.dtype.itemsize
                           + beta_rows.size * beta_rows.dtype.itemsize
                           + beta_full.size * 4 + num_tiles * s128 * 4))
    partials = pl.pallas_call(
        _quad_shared_kernel,
        out_shape=jax.ShapeDtypeStruct((1, num_tiles * s128), jnp.float32),
        grid=(num_tiles,),
        in_specs=[pl.BlockSpec((G, tr), lambda i: (0, i)),          # beta columns of this tile
                  pl.BlockSpec((G, s128), lambda i: (0, 0)),        # beta resident
                  pl.BlockSpec((G, 1), lambda i: (0, 0)),           # scales resident
                  pl.BlockSpec((tr, s128), lambda i: (i, 0))],      # InvCov streamed
        out_specs=pl.BlockSpec((1, s128), lambda i: (0, i)),        # lane-dense partial rows
        compiler_params=pltpu.CompilerParams(
            dimension_semantics=("parallel",), vmem_limit_bytes=vmem_limit),
        cost_estimate=cost,
    )(beta_rows, beta_full, scales, invcov_p)
    return jnp.sum(partials)


def _quad_grouped(beta_rows, beta_full, scales, invcov_p, s128, tr, num_tiles, vmem_limit):
    G = beta_rows.shape[0]
    beta_rt3 = beta_rows[:, None, :]                                   # (G, 1, S_rows)
    beta_full3 = beta_full[:, None, :]                                 # (G, 1, S_pad)
    cost = pl.CostEstimate(
        flops=int(2 * invcov_p.shape[1] * s128 * G + 2 * G * s128 * num_tiles),
        transcendentals=0,
        bytes_accessed=int(invcov_p.size * invcov_p.dtype.itemsize
                           + beta_rt3.size * beta_rt3.dtype.itemsize
                           + beta_full3.size * 4 + G * num_tiles * s128 * 4))
    grid_spec = pltpu.PrefetchScalarGridSpec(
        num_scalar_prefetch=1,                                         # scales -> SMEM
        grid=(G, num_tiles),
        in_specs=[pl.BlockSpec((1, 1, tr), lambda g, i, sc: (g, 0, i)),
                  pl.BlockSpec((1, 1, s128), lambda g, i, sc: (g, 0, 0)),
                  pl.BlockSpec((1, tr, s128), lambda g, i, sc: (g, i, 0))],
        out_specs=pl.BlockSpec((1, s128), lambda g, i, sc: (0, g * num_tiles + i)))
    partials = pl.pallas_call(
        _quad_grouped_kernel,
        out_shape=jax.ShapeDtypeStruct((1, G * num_tiles * s128), jnp.float32),
        grid_spec=grid_spec,
        compiler_params=pltpu.CompilerParams(
            dimension_semantics=("parallel", "parallel"), vmem_limit_bytes=vmem_limit),
        cost_estimate=cost,
    )(scales, beta_rt3, beta_full3, invcov_p)
    return jnp.sum(partials)


def quadratic_spatial_loss(beta, invcov_p, confidences, dims, vmem_limit, normalize=True):
    """Pallas version of quadratic_loss / sparse_quadratic_loss (dense math).

    beta: (G, S); invcov_p: padded (S_rows, S_pad) [shared] or (G, S_rows, S_pad) [grouped];
    confidences: scalar or (G,).
    """
    G, S = beta.shape
    s128, s_rows, tr = dims
    num_tiles = s_rows // tr
    mdt = invcov_p.dtype
    beta_rows = _pad_dims(beta, (G, s_rows)).astype(mdt)               # MXU lhs (stored dtype)
    beta_full = _pad_dims(beta, (G, s128)).astype(jnp.float32)         # elementwise factor
    scales = jnp.broadcast_to(jnp.asarray(confidences, jnp.float32), (G,))

    if invcov_p.ndim == 2:
        loss = _quad_shared(beta_rows, beta_full, scales.reshape(G, 1),
                            invcov_p, s128, tr, num_tiles, vmem_limit)
    else:
        assert invcov_p.shape[0] == G, "per-group inv_cov must match num_group"
        loss = _quad_grouped(beta_rows, beta_full, scales,
                             invcov_p, s128, tr, num_tiles, vmem_limit)
    if normalize:
        loss = loss / (G * S)
    return loss


def kl_spatial_loss(coefs, w_padded, nnz, dims, vmem_limit):
    """Pallas version of kl_loss(softmax(coefs, dim=0), weights).

    The loop-invariant softmax work is hoisted here ((G,S)-sized, once per call); `nnz`
    (number of nonzero weights) is precomputed once since the weight matrix is fixed.
    """
    G, _ = coefs.shape
    s128, s_rows, tr = dims
    num_tiles = s_rows // tr

    coefs_p = _pad_dims(coefs.astype(jnp.float32), (G, s_rows))
    p = jax.nn.softmax(coefs_p, axis=0) + 1e-20                        # matches torch kl_loss
    logp = jnp.log(p)
    d = jnp.sum(p * logp, axis=0, keepdims=True)                       # (1, S_rows) = diag(ce)
    dp = jnp.concatenate([d, p], axis=0).astype(w_padded.dtype)        # (G+1, S_rows)
    logp_cols = logp[:, :s128]                                         # (G, S_pad)
    nnz = jnp.maximum(nnz, 1).astype(jnp.float32)                      # guard all-zero swm

    cost = pl.CostEstimate(
        flops=int(2 * (G + 1) * s_rows * s128 + 3 * G * s128 * num_tiles),
        transcendentals=0,
        bytes_accessed=int(w_padded.size * w_padded.dtype.itemsize
                           + dp.size * dp.dtype.itemsize
                           + logp_cols.size * 4 + num_tiles * s128 * 4))
    partials = pl.pallas_call(
        _kl_kernel,
        out_shape=jax.ShapeDtypeStruct((1, num_tiles * s128), jnp.float32),
        grid=(num_tiles,),
        in_specs=[pl.BlockSpec((G + 1, tr), lambda i: (0, i)),          # hoisted p/diag tile
                  pl.BlockSpec((G, s128), lambda i: (0, 0)),            # log p resident
                  pl.BlockSpec((tr, s128), lambda i: (i, 0))],          # w streamed
        out_specs=pl.BlockSpec((1, s128), lambda i: (0, i)),
        compiler_params=pltpu.CompilerParams(
            dimension_semantics=("parallel",), vmem_limit_bytes=vmem_limit),
        cost_estimate=cost,
    )(dp, logp_cols, w_padded)
    return jnp.sum(partials) / nnz


class SpatialLossPallas:
    """JAX/Pallas re-implementation of SpatialLoss.forward.

    Call-invariant work (precision construction, lane/tile padding, nnz of the KL weight
    matrix, generation-aware tile sizing) is done once here; the per-call kernels only
    stream the big operands.  `matrix_dtype=jnp.bfloat16` optionally stores the fixed
    precision/weight matrices in bf16 to halve HBM traffic (validate tolerance first).
    """

    def __init__(self, prior, swm=None, rho=1.0, matrix_dtype=None):
        valid = ['kl', 'sma', 'sar', 'isar', 'car', 'icar']
        if prior not in valid:
            raise NotImplementedError(f'prior must be one of {valid}')
        self.prior = prior
        self.rho = rho
        self._vmem_limit, tile_budget = _gen_budgets()

        if prior == 'kl':
            self.swm = swm                                             # (S, S), unpadded
            S = swm.shape[-1]
            s128 = _round_up(S, _LANE)
            w = swm.astype(matrix_dtype) if matrix_dtype is not None else swm
            tr = _pick_tile_rows(s128, s128 * w.dtype.itemsize, tile_budget)
            s_rows = _round_up(s128, tr)
            self._swm_p = _pad_dims(w, (s_rows, s128))                 # zero padding (invariant!)
            self._kl_dims = (s128, s_rows, tr)
            self.nnz = jnp.sum(swm != 0)                               # hoisted, swm is fixed
            self.inv_cov = None
            self.confidences = None
        else:
            # swm: (K, S, S), K in {1, num_group}.  Synthetic ICAR-style precision:
            # inv_cov[k] = D_k - rho * W_k (stands in for SpatialWeightMatrix.get_inv_cov).
            deg = jnp.sum(swm, axis=-1)                                # (K, S)
            self.inv_cov = jax.vmap(jnp.diag)(deg) - rho * swm         # (K, S, S), unpadded f32
            S = swm.shape[-1]
            s128 = _round_up(S, _LANE)
            ic = (self.inv_cov.astype(matrix_dtype) if matrix_dtype is not None
                  else self.inv_cov)
            tr = _pick_tile_rows(s128, s128 * ic.dtype.itemsize, tile_budget)
            s_rows = _round_up(s128, tr)
            padded = _pad_dims(ic, (ic.shape[0], s_rows, s128))
            # Squeeze the shared case once here (avoids a per-call reshape/copy).
            self._inv_cov_p = padded[0] if padded.shape[0] == 1 else padded
            self._quad_dims = (s128, s_rows, tr)
            self.confidences = jnp.ones((swm.shape[0],), jnp.float32)
            self.swm = None

    def forward(self, coefs, normalize=True):
        if self.prior == 'kl':
            return kl_spatial_loss(coefs, self._swm_p, self.nnz,
                                   self._kl_dims, self._vmem_limit)
        return quadratic_spatial_loss(coefs, self._inv_cov_p, self.confidences,
                                      self._quad_dims, self._vmem_limit,
                                      normalize=normalize)


# ----------------------------------------------------------------------------- pure-JAX refs

def _quad_ref(beta, inv_cov, confidences, normalize=True):
    G, S = beta.shape
    scales = jnp.broadcast_to(confidences, (G,))
    if inv_cov.shape[0] == 1:
        q = jnp.diag(beta @ inv_cov[0] @ beta.T)
    else:
        q = jnp.einsum('gs,gst,gt->g', beta, inv_cov, beta)
    loss = jnp.sum(q * scales)
    if normalize:
        loss = loss / (G * S)
    return loss


def _kl_ref(coefs, weights):
    p = jax.nn.softmax(coefs, axis=0) + 1e-20
    ce = p.T @ jnp.log(p)
    kl = jnp.diag(ce).reshape(-1, 1) - ce
    return jnp.sum(kl * weights) / jnp.sum(weights != 0)


# ----------------------------------------------------------------------------- main

if __name__ == "__main__":
    key = jax.random.PRNGKey(0)
    G, S = 4, 16  # num_group, num_spot

    k1, k2, k3 = jax.random.split(key, 3)
    coefs = jax.random.normal(k1, (G, S), dtype=jnp.float32)

    # Deterministic synthetic spatial weight matrices: symmetric, nonneg, zero diagonal,
    # sparsified so the KL branch has genuine zero entries.
    raw = jax.random.uniform(k2, (G, S, S), dtype=jnp.float32)
    mask = (jax.random.uniform(k3, (G, S, S)) > 0.5).astype(jnp.float32)
    W = raw * mask
    W = 0.5 * (W + jnp.transpose(W, (0, 2, 1)))
    W = W * (1.0 - jnp.eye(S, dtype=jnp.float32))     # zero diagonal

    # --- branch 1: quadratic loss, shared covariance (inv_cov shape (1, S, S)) ---
    loss_shared_mod = SpatialLossPallas('icar', swm=W[:1], rho=0.9)
    out1 = jax.block_until_ready(loss_shared_mod.forward(coefs))
    ref1 = _quad_ref(coefs, loss_shared_mod.inv_cov, loss_shared_mod.confidences)

    # --- branch 2: quadratic loss, per-group covariance (inv_cov shape (G, S, S)) ---
    loss_group_mod = SpatialLossPallas('car', swm=W, rho=0.9)
    out2 = jax.block_until_ready(loss_group_mod.forward(coefs))
    ref2 = _quad_ref(coefs, loss_group_mod.inv_cov, loss_group_mod.confidences)

    # --- branch 3: KL prior ---
    kl_mod = SpatialLossPallas('kl', swm=W[0])
    out3 = jax.block_until_ready(kl_mod.forward(coefs))
    ref3 = _kl_ref(coefs, W[0])

    np.testing.assert_allclose(np.asarray(out1), np.asarray(ref1), rtol=1e-4, atol=1e-5)
    np.testing.assert_allclose(np.asarray(out2), np.asarray(ref2), rtol=1e-4, atol=1e-5)
    np.testing.assert_allclose(np.asarray(out3), np.asarray(ref3), rtol=1e-4, atol=1e-5)

    print("KERNEL_OK")
</pallas_src>

<mosaic_0001>
module attributes {stable_mosaic.version = 11 : i64} {
  func.func @_quad_shared_kernel(%arg0: i32, %arg1: memref<4x128xf32, #tpu.memory_space<vmem>>, %arg2: memref<4x128xf32, #tpu.memory_space<vmem>>, %arg3: memref<4x1xf32, #tpu.memory_space<vmem>>, %arg4: memref<128x128xf32, #tpu.memory_space<vmem>>, %arg5: memref<1x128xf32, #tpu.memory_space<vmem>>) attributes {dimension_semantics = [#tpu.dimension_semantics<parallel>], iteration_bounds = array<i64: 1>, scalar_prefetch = 0 : i64, scratch_operands = 0 : i64, tpu.core_type = #tpu.core_type<tc>, window_params = [{transform_indices = @transform_0, window_bounds = array<i64: 4, 128>}, {pipeline_mode = #tpu.pipeline_mode<synchronous>, transform_indices = @transform_1, window_bounds = array<i64: 4, 128>}, {pipeline_mode = #tpu.pipeline_mode<synchronous>, transform_indices = @transform_2, window_bounds = array<i64: 4, 1>}, {transform_indices = @transform_3, window_bounds = array<i64: 128, 128>}, {transform_indices = @transform_4, window_bounds = array<i64: 1, 128>}]} {
    %c0 = arith.constant 0 : index
    %c0_0 = arith.constant 0 : index
    %0 = vector.load %arg1[%c0, %c0_0] : memref<4x128xf32, #tpu.memory_space<vmem>>, vector<4x128xf32>
    %c0_1 = arith.constant 0 : index
    %c0_2 = arith.constant 0 : index
    %1 = vector.load %arg4[%c0_1, %c0_2] : memref<128x128xf32, #tpu.memory_space<vmem>>, vector<128x128xf32>
    %cst = arith.constant dense<0.000000e+00> : vector<4x128xf32>
    %2 = tpu.matmul %0, %1, %cst {dimension_numbers = #tpu.dot_dimension_numbers<[1], [0], [0], [1], [0, 0, 1, 1], [], []>} : vector<4x128xf32>, vector<128x128xf32>, vector<4x128xf32> -> vector<4x128xf32>
    %c0_3 = arith.constant 0 : index
    %c0_4 = arith.constant 0 : index
    %3 = vector.load %arg2[%c0_3, %c0_4] : memref<4x128xf32, #tpu.memory_space<vmem>>, vector<4x128xf32>
    %4 = arith.mulf %2, %3 : vector<4x128xf32>
    %c0_5 = arith.constant 0 : index
    %c0_6 = arith.constant 0 : index
    %5 = vector.load %arg3[%c0_5, %c0_6] : memref<4x1xf32, #tpu.memory_space<vmem>>, vector<4x1xf32>
    %6 = vector.broadcast %5 : vector<4x1xf32> to vector<4x128xf32>
    %7 = arith.mulf %4, %6 : vector<4x128xf32>
    %cst_7 = arith.constant dense<0.000000e+00> : vector<128xf32>
    %8 = vector.multi_reduction <add>, %7, %cst_7 [0] : vector<4x128xf32> to vector<128xf32>
    %9 = vector.shape_cast %8 : vector<128xf32> to vector<1x128xf32>
    %c0_8 = arith.constant 0 : index
    %c0_9 = arith.constant 0 : index
    %10 = vector.load %arg5[%c0_8, %c0_9] : memref<1x128xf32, #tpu.memory_space<vmem>>, vector<1x128xf32>
    tpu.vector_store %arg5[%c0_8, %c0_9], %9 {strides = array<i32>} : memref<1x128xf32, #tpu.memory_space<vmem>>, vector<1x128xf32>,
    return
  }
  func.func @transform_0(%arg0: i32) -> (i32, i32) {
    %c0_i32 = arith.constant 0 : i32
    %c0_i32_0 = arith.constant 0 : i32
    return %c0_i32, %arg0 : i32, i32
  }
  func.func @transform_1(%arg0: i32) -> (i32, i32) {
    %c0_i32 = arith.constant 0 : i32
    %c0_i32_0 = arith.constant 0 : i32
    %c0_i32_1 = arith.constant 0 : i32
    return %c0_i32, %c0_i32_0 : i32, i32
  }
  func.func @transform_2(%arg0: i32) -> (i32, i32) {
    %c0_i32 = arith.constant 0 : i32
    %c0_i32_0 = arith.constant 0 : i32
    %c0_i32_1 = arith.constant 0 : i32
    return %c0_i32, %c0_i32_0 : i32, i32
  }
  func.func @transform_3(%arg0: i32) -> (i32, i32) {
    %c0_i32 = arith.constant 0 : i32
    %c0_i32_0 = arith.constant 0 : i32
    return %arg0, %c0_i32 : i32, i32
  }
  func.func @transform_4(%arg0: i32) -> (i32, i32) {
    %c0_i32 = arith.constant 0 : i32
    %c0_i32_0 = arith.constant 0 : i32
    return %c0_i32, %arg0 : i32, i32
  }
}

</mosaic_0001>

<bundles_post_ra>
// kernel: tpu_custom_call.1
= control target key start
LH: loop header
LB: loop body
LE: loop exit
PB: predicated region body
PF: predicated region fallthrough
CT: control target
= control target key end

     0   :  { %9 = vsyncpa [#allocation3], 0  ;;  %s351_s0 = inlined_call_operand.vmem [shape: f32[4,128], index: 0, kind: input, shape index: {}]   ;;  %s352_s1 = inlined_call_operand.vmem [shape: f32[4,128], index: 1, kind: input, shape index: {}]   ;;  %s353_s2 = inlined_call_operand.vmem [shape: f32[4,1], index: 2, kind: input, shape index: {}]   ;;  %s354_s3 = inlined_call_operand.hbm [shape: f32[128,128], index: 3, kind: input, shape index: {}]   ;;  %s355_s4 = inlined_call_operand.hbm [shape: f32[1,128], index: 4, kind: output, shape index: {}]  }
   0x1   :  { %10 = vsyncpa [#allocation4], 0  ;;  %s285_s15 = smov [#allocation2]   ;;  %s237_s19 = scalar_lea.hbm %s354_s3, 2048 }
   0x2   :  { %s22_s16 = sshll.u32 %s285_s15, 4  ;;  %p238_p0 = scmp.ne.s32.totalorder %s354_s3, %s237_s19  ;;  %s23_s16 = int_to_ptr.vmem [resolvable:$true] %s22_s16 }
   0x3   :  { %p241_p1 = scmp.lt.u32.totalorder %s237_s19, %s354_s3 }
   0x5   :  { %p243_p2 = pnand %p241_p1, %p238_p0 }
   0x7   :  { %246 = shalt.err (!%p243_p2)
}
   0x8   :  { %s247_s24 = scalar_lea.vmem %s23_s16, 2048  ;;  %p252_p4 = scmp.lt.s32.totalorder %s23_s16, %s23_s16 }
   0x9   :  { %p248_p3 = scmp.ne.s32.totalorder %s23_s16, %s247_s24  ;;  %p253_p5 = scmp.lt.s32.totalorder %s247_s24, %s247_s24 }
   0xb   :  { %p254_p6 = por %p253_p5, %p252_p4 }
   0xd   :  { %p255_p7 = pnand %p254_p6, %p248_p3 }
   0xf   :  { %258 = shalt.err (!%p255_p7)
}
  0x10   :  { %s286_s25 = smov 128   ;;  %s287_s26 = smov 8  }
  0x11   :  { %28 = dma.hbm_to_vmem [thread:$0]  %s354_s3, 2048, %s23_s16, [#allocation3], %s286_s25, %s286_s25, %s287_s26  }
  0x12   :  { %281 = dma.done.wait [#allocation3], 2048  }
  0x13   :  { %282 = vsyncadd [#allocation3], 4294965248  ;;  %v288_v0 = vmov 0.0|0.0   ;;  %vm289_vm0 = vmmov 0   ;;  %v290_v1 = vmov 0.0   ;;  %v291_v2 = vmov 0  }
  0x14   :  { %204 = vmatprep.subr.bf16.mxu0 %v288_v0  ;;  %201 = vmatprep.mubr.msk.f32.mxu0 %vm289_vm0, %v290_v1  ;;  %v33_v3 = vld [vmem:[#allocation2] sm:$0xff]  ;;  %v34_v4 = vld [vmem:[#allocation2 + $0x8] sm:$0xff]  ;;  %v35_v5 = vld [vmem:[#allocation2 + $0x10] sm:$0xff]  ;;  %vm128_vm1 = vcmask 1043456   ;;  %s292_s7 = smov [#allocation5]  }
  0x15   :  { %236 = vset.pattern.permute.xlu0 %v291_v2  ;;  %v205_v6 = vpack.c.bf16 %v34_v4, %v33_v3  ;;  %v36_v7 = vld [vmem:[#allocation2 + $0x18] sm:$0xff]  ;;  %v37_v9 = vld [vmem:[#allocation2 + $0x20] sm:$0xff]  ;;  %v38_v10 = vld [vmem:[#allocation2 + $0x28] sm:$0xff]  ;;  %s143_s8 = sshll.u32 %s292_s7, 4  ;;  %s144_s8 = int_to_ptr.vmem [resolvable:$true] %s143_s8 }
  0x16   :  { %v208_v8 = vpack.c.bf16 %v36_v7, %v35_v5  ;;  %v121_v11 = vld [vmem:[%s353_s2] sm:$0xf]  ;;  %v211_v12 = vpack.c.bf16 %v38_v10, %v37_v9  ;;  %v39_v13 = vld [vmem:[#allocation2 + $0x30] sm:$0xff]  ;;  %v40_v14 = vld [vmem:[#allocation2 + $0x38] sm:$0xff]  ;;  %p264_p9 = scmp.lt.s32.totalorder %s144_s8, %s144_s8 }
  0x17   :  { %206 = vmatpush3.bf16.msra.mxu0 %v205_v6  ;;  %124 = vperm.xlu0 %236, %v121_v11   ;;  %v214_v15 = vpack.c.bf16 %v40_v14, %v39_v13  ;;  %v41_v16 = vld [vmem:[#allocation2 + $0x40] sm:$0xff]  ;;  %v42_v17 = vld [vmem:[#allocation2 + $0x48] sm:$0xff]  ;;  %v43_v19 = vld [vmem:[#allocation2 + $0x50] sm:$0xff] }
  0x18   :  { %207 = vmatprep.subr.bf16.mxu0 %v288_v0  ;;  %v217_v18 = vpack.c.bf16 %v42_v17, %v41_v16  ;;  %v44_v20 = vld [vmem:[#allocation2 + $0x58] sm:$0xff]  ;;  %v45_v22 = vld [vmem:[#allocation2 + $0x60] sm:$0xff]  ;;  %v46_v23 = vld [vmem:[#allocation2 + $0x68] sm:$0xff] }
  0x19   :  { %v220_v21 = vpack.c.bf16 %v44_v20, %v43_v19  ;;  %v223_v24 = vpack.c.bf16 %v46_v23, %v45_v22  ;;  %v47_v25 = vld [vmem:[#allocation2 + $0x70] sm:$0xff]  ;;  %v48_v26 = vld [vmem:[#allocation2 + $0x78] sm:$0xff]  ;;  %v32_v28 = vld [vmem:[%s351_s0] sm:$0xf]  ;;  %s259_s0 = scalar_lea.vmem %s144_s8, 16 }
  0x1a   :  { %v226_v27 = vpack.c.bf16 %v48_v26, %v47_v25  ;;  %v119_v29 = vld [vmem:[%s352_s1] sm:$0xf]  ;;  %p260_p8 = scmp.ne.s32.totalorder %s144_s8, %s259_s0  ;;  %s263_s1 = scalar_lea.vmem %s144_s8, 32 }
  0x1b   :  { %209 = vmatpush3.bf16.msra.mxu0 %v208_v8  ;;  %p265_p10 = scmp.lt.s32.totalorder %s263_s1, %s259_s0 }
  0x1c   :  { %210 = vmatprep.subr.bf16.mxu0 %v288_v0 }
  0x1d   :  { %p266_p11 = por %p265_p10, %p264_p9 }
  0x1f   :  { %212 = vmatpush3.bf16.msra.mxu0 %v211_v12  ;;  %p267_p12 = pnand %p266_p11, %p260_p8 }
  0x20   :  { %213 = vmatprep.subr.bf16.mxu0 %v288_v0 }
  0x23   :  { %215 = vmatpush3.bf16.msra.mxu0 %v214_v15 }
  0x24   :  { %216 = vmatprep.subr.bf16.mxu0 %v288_v0 }
  0x27   :  { %218 = vmatpush3.bf16.msra.mxu0 %v217_v18 }
  0x28   :  { %219 = vmatprep.subr.bf16.mxu0 %v288_v0 }
  0x2b   :  { %221 = vmatpush3.bf16.msra.mxu0 %v220_v21 }
  0x2c   :  { %222 = vmatprep.subr.bf16.mxu0 %v288_v0 }
  0x2f   :  { %224 = vmatpush3.bf16.msra.mxu0 %v223_v24 }
  0x30   :  { %225 = vmatprep.subr.bf16.mxu0 %v288_v0 }
  0x33   :  { %227 = vmatpush3.bf16.msra.mxu0 %v226_v27 }
  0x36   :  { %202 = vmatmul.mubr.f32.vlgmr.msra.gmra.mrb[0].mxu0 %v32_v28 }
  0x96   :  { %v125_v31 = vpop.permute.xlu0 %124 }
 0x109   :  { %v115_v30 = vpop.f32.mrb[0].mxu0 }
 0x10a   :  { %v120_v32 = vmul.f32 %v119_v29, %v115_v30  ;;  %v203_v33 = vpop.f32.mrb[1].mxu0 }
 0x10c   :  { %v127_v34 = vmul.f32 %v125_v31, %v120_v32 }
 0x10e   :  { %v129_v35 = vsel %vm128_vm1, %v127_v34, 0.0 }
 0x10f   :  { %v130_v36 = vrot.slane %v129_v35, 4 }
 0x111   :  { %v131_v37 = vadd.f32 %v130_v36, %v129_v35 }
 0x113   :  { %v132_v38 = vrot.slane %v131_v37, 2 }
 0x115   :  { %v133_v39 = vadd.f32 %v132_v38, %v131_v37 }
 0x117   :  { %v134_v40 = vrot.slane %v133_v39, 1 }
 0x119   :  { %v135_v41 = vadd.f32 %v134_v40, %v133_v39 }
 0x11b   :  { %136 = vst [vmem:[#allocation5] sm:$0x1] %v135_v41 }
 0x11c   :  { %270 = shalt.err (!%p267_p12)
}
 0x11d   :  { %s271_s11 = scalar_lea.hbm %s355_s4, 16 }
 0x11e   :  { %p272_p13 = scmp.ne.s32.totalorder %s355_s4, %s271_s11  ;;  %p275_p0 = scmp.lt.u32.totalorder %s271_s11, %s355_s4 }
 0x120   :  { %p277_p1 = pnand %p275_p0, %p272_p13 }
 0x122   :  { %280 = shalt.err (!%p277_p1)
}
 0x123   :  { %146 = dma.vmem_to_hbm [thread:$0]  %s144_s8, 16, %s355_s4, [#allocation4]  }
 0x124   :  { %283 = dma.done.wait [#allocation4], 16  }
 0x125   :  { %284 = vsyncadd [#allocation4], 4294967280 }
 0x126   :  { %150 = vsyncpa [#allocation3], 1 }
 0x127   :  { %151 = vsyncpa [#allocation4], 1 }

</bundles_post_ra>
